<compile_context>
chip_gen: v7x
topology: tpu7x:2x2x1
jax: 0.10.0
libtpu: 0.0.40
codegen_flags: <defaults>
</compile_context>

<pallas_src>
import numpy as np
import jax
import jax.numpy as jnp
from jax.experimental import pallas as pl
from jax.experimental.pallas import tpu as pltpu


def _make_kernel(L, C):
    """Kernel over one block of R = TB*L rows (TB independent batches of length L)."""
    repack = (C % 128 == 0)          # K-repacked (K = 2*C) MXU path for lane-aligned C
    pow2 = (L & (L - 1)) == 0

    def kernel(x_ref, w_ref, b_ref, o_ref):
        # x_ref: (R, C) bf16   w_ref: (2, 2C, C) bf16   b_ref: (1, C) f32
        # o_ref: (2, R, C) bf16  -- slab 0 = even outputs, slab 1 = odd outputs
        R = x_ref.shape[0]
        x = x_ref[...]

        # Row position within its length-L segment, (R, 1) only; batches are folded
        # into R so every block starts on a batch boundary.
        row = jax.lax.broadcasted_iota(jnp.int32, (R, 1), 0)
        pos = (row & (L - 1)) if pow2 else (row % L)
        first = pos == 0
        last = pos == (L - 1)

        bias = b_ref[...]                                   # (1, C) f32

        if repack:
            # Neighbour rows via XLU sublane roll on the bf16 input + boundary mask.
            zero = jnp.zeros((), dtype=x.dtype)
            x_prev = jnp.where(first, zero, pltpu.roll(x, shift=1, axis=0))      # x[m-1]
            x_next = jnp.where(last, zero, pltpu.roll(x, shift=R - 1, axis=0))   # x[m+1]
            # Taps packed into the contraction dim: two K=2C bf16 matmuls (f32 acc);
            # the neighbour-tap sums are absorbed into MXU accumulation.
            even = jnp.dot(jnp.concatenate([x_prev, x], axis=1), w_ref[0],
                           preferred_element_type=jnp.float32)   # x[m-1]@W3 + x[m]@W1
            odd = jnp.dot(jnp.concatenate([x, x_next], axis=1), w_ref[1],
                          preferred_element_type=jnp.float32)    # x[m]@W2 + x[m+1]@W0
        else:
            # Narrow-channel fallback: fully unpadded small dots; shift the f32 results.
            w_e = w_ref[0]
            w_o = w_ref[1]
            w3, w1 = w_e[:C], w_e[C:]
            w2, w0 = w_o[:C], w_o[C:]
            z1 = jnp.dot(x, w1, preferred_element_type=jnp.float32)
            z3 = jnp.dot(x, w3, preferred_element_type=jnp.float32)
            z2 = jnp.dot(x, w2, preferred_element_type=jnp.float32)
            z0 = jnp.dot(x, w0, preferred_element_type=jnp.float32)
            zero_f = jnp.zeros((), jnp.float32)
            even = z1 + jnp.where(first, zero_f, pltpu.roll(z3, shift=1, axis=0))
            odd = z2 + jnp.where(last, zero_f, pltpu.roll(z0, shift=R - 1, axis=0))

        o_ref[0] = (even + bias).astype(o_ref.dtype)   # even slab
        o_ref[1] = (odd + bias).astype(o_ref.dtype)    # odd slab

    return kernel


def _pick_tb(B, L, C, *, budget_bytes=12 * 1024 * 1024, target_steps=4):
    """Pick TB (batches folded per grid step):
       - block rows TB*L must be a multiple of 8 (or cover all rows),
       - per-step VMEM footprint (incl. single-buffered weights) within budget,
       - prefer >= target_steps grid steps (pipeline overlap / 2 TCs on v7x)."""

    def rows_ok(tb):
        return ((tb * L) % 8 == 0) or (tb == B)

    def footprint(tb):
        rows = tb * L
        x_blk = rows * C * 2                       # bf16 input block
        o_blk = 2 * rows * C * 2                   # bf16 output block (even + odd)
        interm = rows * C * 24                     # bf16 shift/cat temps + f32 accumulators
        w_b = 2 * (2 * C) * C * 2 + C * 4          # single-buffered packed weights + bias
        return 2 * (x_blk + o_blk) + interm + w_b  # x / out are double-buffered

    divs = [d for d in range(1, B + 1) if B % d == 0]
    fits = [d for d in divs if rows_ok(d) and footprint(d) <= budget_bytes]
    if not fits:
        # TODO(synk): split L into halo'd row chunks when even TB=1 overflows the budget.
        return B if rows_ok(B) else 1
    want = min(target_steps, B)
    good = [d for d in fits if (B // d) >= want]
    return max(good) if good else min(fits)


@jax.jit
def upsample1d_forward(x_ncl, weight, bias):
    """x_ncl: (B, C, L); weight: (C_in, C_out, 4); bias: (C,).
    Returns (B, C, 2L), matching nn.ConvTranspose1d(C, C, 4, 2, 1)."""
    B, C, L = x_ncl.shape
    out_dtype = x_ncl.dtype

    # ---- parameter prep (fused/hoisted by jit): pack taps along K, bf16 cast ----
    w = weight.astype(jnp.float32)                               # (C, C, 4)
    w_even = jnp.concatenate([w[:, :, 3], w[:, :, 1]], axis=0)   # rows [0:C]=W3, [C:2C]=W1
    w_odd = jnp.concatenate([w[:, :, 2], w[:, :, 0]], axis=0)    # rows [0:C]=W2, [C:2C]=W0
    w_pack = jnp.stack([w_even, w_odd], axis=0).astype(jnp.bfloat16)   # (2, 2C, C)
    b_row = bias.astype(jnp.float32).reshape(1, C)

    # ---- input prep: NCL -> channels-last rows (B*L, C), bf16, NO channel padding ----
    # TODO(synk): if the surrounding model can keep NLC layout end-to-end, this
    # transpose (and the output one) disappears.
    x_rows = jnp.transpose(x_ncl, (0, 2, 1)).reshape(B * L, C).astype(jnp.bfloat16)

    TB = _pick_tb(B, L, C)
    R = TB * L
    grid = (B // TB,)

    slabs = pl.pallas_call(
        _make_kernel(L, C),
        out_shape=jax.ShapeDtypeStruct((2, B * L, C), jnp.bfloat16),
        grid_spec=pltpu.PrefetchScalarGridSpec(
            num_scalar_prefetch=0,
            grid=grid,
            in_specs=[
                pl.BlockSpec((R, C), lambda i: (i, 0)),           # x rows for TB batches
                pl.BlockSpec((2, 2 * C, C), lambda i: (0, 0, 0),  # packed tap weights
                             pipeline_mode=pl.Buffered(1)),
                pl.BlockSpec((1, C), lambda i: (0, 0),            # bias
                             pipeline_mode=pl.Buffered(1)),
            ],
            out_specs=pl.BlockSpec((2, R, C), lambda i: (0, i, 0)),
        ),
        compiler_params=pltpu.CompilerParams(
            dimension_semantics=("parallel",),
            vmem_limit_bytes=32 * 1024 * 1024),
    )(x_rows, w_pack, b_row)

    # (2, B*L, C) -> (B, C, 2L): even/odd interleave + upcast folded into one transpose.
    out = slabs.reshape(2, B, L, C)
    out = jnp.transpose(out, (1, 3, 2, 0)).reshape(B, C, 2 * L)
    return out.astype(out_dtype)


def _reference_conv_transpose1d(x, w, b):
    """Direct-from-definition reference (numpy), stride=2, padding=1, k=4."""
    B, C_in, L = x.shape
    _, C_out, K = w.shape
    L_out = (L - 1) * 2 - 2 * 1 + K
    y = np.tile(b.reshape(1, C_out, 1), (B, 1, L_out)).astype(np.float64)
    for i in range(L):
        for k in range(K):
            t = i * 2 - 1 + k
            if 0 <= t < L_out:
                y[:, :, t] += np.einsum("bi,io->bo", x[:, :, i], w[:, :, k])
    return y


def _run_case(key, B, dim, L):
    k_x, k_w, k_b = jax.random.split(key, 3)
    fan_in = dim * 4
    bound = 1.0 / np.sqrt(fan_in)
    weight = jax.random.uniform(k_w, (dim, dim, 4), jnp.float32, -bound, bound)
    bias = jax.random.uniform(k_b, (dim,), jnp.float32, -bound, bound)
    x = jax.random.normal(k_x, (B, dim, L), jnp.float32)

    out = jax.block_until_ready(upsample1d_forward(x, weight, bias))
    assert out.shape == (B, dim, 2 * L), out.shape

    ref = _reference_conv_transpose1d(
        np.asarray(x, np.float64), np.asarray(weight, np.float64),
        np.asarray(bias, np.float64))
    # bf16 MXU inputs + bf16 slab storage (f32 accumulate): loosened tolerance.
    np.testing.assert_allclose(np.asarray(out, np.float64), ref,
                               rtol=3e-2, atol=3e-2)


if __name__ == "__main__":
    key = jax.random.PRNGKey(0)
    k1, k2 = jax.random.split(key)

    # Narrow-channel fallback path (no padding anywhere).
    _run_case(k1, B=2, dim=8, L=16)
    # Lane-aligned path: K-repacked (K = 2*C = 256) MXU matmuls.
    _run_case(k2, B=2, dim=128, L=16)

    print("KERNEL_OK")
</pallas_src>

<mosaic_0001>
module attributes {stable_mosaic.version = 11 : i64} {
  func.func @kernel(%arg0: i32, %arg1: memref<16x8xbf16, #tpu.memory_space<vmem>>, %arg2: memref<2x16x8xbf16, #tpu.memory_space<vmem>>, %arg3: memref<1x8xf32, #tpu.memory_space<vmem>>, %arg4: memref<2x16x8xbf16, #tpu.memory_space<vmem>>) attributes {dimension_semantics = [#tpu.dimension_semantics<parallel>], iteration_bounds = array<i64: 2>, scalar_prefetch = 0 : i64, scratch_operands = 0 : i64, tpu.core_type = #tpu.core_type<tc>, window_params = [{transform_indices = @transform_0, window_bounds = array<i64: 16, 8>}, {pipeline_mode = #tpu.pipeline_mode<synchronous>, transform_indices = @transform_1, window_bounds = array<i64: 2, 16, 8>}, {pipeline_mode = #tpu.pipeline_mode<synchronous>, transform_indices = @transform_2, window_bounds = array<i64: 1, 8>}, {transform_indices = @transform_3, window_bounds = array<i64: 2, 16, 8>}]} {
    %c0 = arith.constant 0 : index
    %c0_0 = arith.constant 0 : index
    %0 = vector.load %arg1[%c0, %c0_0] : memref<16x8xbf16, #tpu.memory_space<vmem>>, vector<16x8xbf16>
    %1 = tpu.iota {dimensions = array<i32: 0>} : vector<16x1xi32>
    %c15_i32 = arith.constant 15 : i32
    %2 = vector.broadcast %c15_i32 : i32 to vector<16x1xi32>
    %3 = arith.andi %1, %2 : vector<16x1xi32>
    %c0_i32 = arith.constant 0 : i32
    %4 = vector.broadcast %c0_i32 : i32 to vector<16x1xi32>
    %5 = arith.cmpi eq, %3, %4 : vector<16x1xi32>
    %c15_i32_1 = arith.constant 15 : i32
    %6 = vector.broadcast %c15_i32_1 : i32 to vector<16x1xi32>
    %7 = arith.cmpi eq, %3, %6 : vector<16x1xi32>
    %c0_2 = arith.constant 0 : index
    %c0_3 = arith.constant 0 : index
    %8 = vector.load %arg3[%c0_2, %c0_3] : memref<1x8xf32, #tpu.memory_space<vmem>>, vector<1x8xf32>
    %c0_4 = arith.constant 0 : index
    %c0_5 = arith.constant 0 : index
    %c0_6 = arith.constant 0 : index
    %9 = vector.load %arg2[%c0_4, %c0_5, %c0_6] : memref<2x16x8xbf16, #tpu.memory_space<vmem>>, vector<1x16x8xbf16>
    %10 = vector.shape_cast %9 : vector<1x16x8xbf16> to vector<16x8xbf16>
    %c1 = arith.constant 1 : index
    %c0_7 = arith.constant 0 : index
    %c0_8 = arith.constant 0 : index
    %11 = vector.load %arg2[%c1, %c0_7, %c0_8] : memref<2x16x8xbf16, #tpu.memory_space<vmem>>, vector<1x16x8xbf16>
    %12 = vector.shape_cast %11 : vector<1x16x8xbf16> to vector<16x8xbf16>
    %13 = vector.extract_strided_slice %10 {offsets = [0, 0], sizes = [8, 8], strides = [1, 1]} : vector<16x8xbf16> to vector<8x8xbf16>
    %14 = vector.extract_strided_slice %10 {offsets = [8, 0], sizes = [8, 8], strides = [1, 1]} : vector<16x8xbf16> to vector<8x8xbf16>
    %15 = vector.extract_strided_slice %12 {offsets = [0, 0], sizes = [8, 8], strides = [1, 1]} : vector<16x8xbf16> to vector<8x8xbf16>
    %16 = vector.extract_strided_slice %12 {offsets = [8, 0], sizes = [8, 8], strides = [1, 1]} : vector<16x8xbf16> to vector<8x8xbf16>
    %cst = arith.constant dense<0.000000e+00> : vector<16x8xf32>
    %17 = tpu.matmul %0, %14, %cst {dimension_numbers = #tpu.dot_dimension_numbers<[1], [0], [0], [1], [0, 0, 1, 1], [], []>} : vector<16x8xbf16>, vector<8x8xbf16>, vector<16x8xf32> -> vector<16x8xf32>
    %cst_9 = arith.constant dense<0.000000e+00> : vector<16x8xf32>
    %18 = tpu.matmul %0, %13, %cst_9 {dimension_numbers = #tpu.dot_dimension_numbers<[1], [0], [0], [1], [0, 0, 1, 1], [], []>} : vector<16x8xbf16>, vector<8x8xbf16>, vector<16x8xf32> -> vector<16x8xf32>
    %cst_10 = arith.constant dense<0.000000e+00> : vector<16x8xf32>
    %19 = tpu.matmul %0, %15, %cst_10 {dimension_numbers = #tpu.dot_dimension_numbers<[1], [0], [0], [1], [0, 0, 1, 1], [], []>} : vector<16x8xbf16>, vector<8x8xbf16>, vector<16x8xf32> -> vector<16x8xf32>
    %cst_11 = arith.constant dense<0.000000e+00> : vector<16x8xf32>
    %20 = tpu.matmul %0, %16, %cst_11 {dimension_numbers = #tpu.dot_dimension_numbers<[1], [0], [0], [1], [0, 0, 1, 1], [], []>} : vector<16x8xbf16>, vector<8x8xbf16>, vector<16x8xf32> -> vector<16x8xf32>
    %c1_i32 = arith.constant 1 : i32
    %21 = tpu.dynamic_rotate %18 by %c1_i32 dim 0 : vector<16x8xf32>, i32 -> vector<16x8xf32>
    %cst_12 = arith.constant 0.000000e+00 : f32
    %22 = vector.shape_cast %5 : vector<16x1xi1> to vector<16x1xi1>
    %23 = vector.broadcast %22 : vector<16x1xi1> to vector<16x8xi1>
    %24 = vector.broadcast %cst_12 : f32 to vector<16x8xf32>
    %25 = arith.select %23, %24, %21 : vector<16x8xi1>, vector<16x8xf32>
    %26 = arith.addf %17, %25 : vector<16x8xf32>
    %c15_i32_13 = arith.constant 15 : i32
    %27 = tpu.dynamic_rotate %20 by %c15_i32_13 dim 0 : vector<16x8xf32>, i32 -> vector<16x8xf32>
    %cst_14 = arith.constant 0.000000e+00 : f32
    %28 = vector.shape_cast %7 : vector<16x1xi1> to vector<16x1xi1>
    %29 = vector.broadcast %28 : vector<16x1xi1> to vector<16x8xi1>
    %30 = vector.broadcast %cst_14 : f32 to vector<16x8xf32>
    %31 = arith.select %29, %30, %27 : vector<16x8xi1>, vector<16x8xf32>
    %32 = arith.addf %19, %31 : vector<16x8xf32>
    %33 = vector.broadcast %8 : vector<1x8xf32> to vector<16x8xf32>
    %34 = arith.addf %26, %33 : vector<16x8xf32>
    %35 = arith.truncf %34 : vector<16x8xf32> to vector<16x8xbf16>
    %c0_15 = arith.constant 0 : index
    %c0_16 = arith.constant 0 : index
    %c0_17 = arith.constant 0 : index
    %36 = vector.load %arg4[%c0_15, %c0_16, %c0_17] : memref<2x16x8xbf16, #tpu.memory_space<vmem>>, vector<1x16x8xbf16>
    %37 = vector.shape_cast %36 : vector<1x16x8xbf16> to vector<16x8xbf16>
    %38 = vector.shape_cast %35 : vector<16x8xbf16> to vector<1x16x8xbf16>
    tpu.vector_store %arg4[%c0_15, %c0_16, %c0_17], %38 {strides = array<i32>} : memref<2x16x8xbf16, #tpu.memory_space<vmem>>, vector<1x16x8xbf16>,
    %39 = vector.broadcast %8 : vector<1x8xf32> to vector<16x8xf32>
    %40 = arith.addf %32, %39 : vector<16x8xf32>
    %41 = arith.truncf %40 : vector<16x8xf32> to vector<16x8xbf16>
    %c1_18 = arith.constant 1 : index
    %c0_19 = arith.constant 0 : index
    %c0_20 = arith.constant 0 : index
    %42 = vector.load %arg4[%c1_18, %c0_19, %c0_20] : memref<2x16x8xbf16, #tpu.memory_space<vmem>>, vector<1x16x8xbf16>
    %43 = vector.shape_cast %42 : vector<1x16x8xbf16> to vector<16x8xbf16>
    %44 = vector.shape_cast %41 : vector<16x8xbf16> to vector<1x16x8xbf16>
    tpu.vector_store %arg4[%c1_18, %c0_19, %c0_20], %44 {strides = array<i32>} : memref<2x16x8xbf16, #tpu.memory_space<vmem>>, vector<1x16x8xbf16>,
    return
  }
  func.func @transform_0(%arg0: i32) -> (i32, i32) {
    %c0_i32 = arith.constant 0 : i32
    %c0_i32_0 = arith.constant 0 : i32
    return %arg0, %c0_i32 : i32, i32
  }
  func.func @transform_1(%arg0: i32) -> (i32, i32, i32) {
    %c0_i32 = arith.constant 0 : i32
    %c0_i32_0 = arith.constant 0 : i32
    %c0_i32_1 = arith.constant 0 : i32
    %c0_i32_2 = arith.constant 0 : i32
    return %c0_i32, %c0_i32_0, %c0_i32_1 : i32, i32, i32
  }
  func.func @transform_2(%arg0: i32) -> (i32, i32) {
    %c0_i32 = arith.constant 0 : i32
    %c0_i32_0 = arith.constant 0 : i32
    %c0_i32_1 = arith.constant 0 : i32
    return %c0_i32, %c0_i32_0 : i32, i32
  }
  func.func @transform_3(%arg0: i32) -> (i32, i32, i32) {
    %c0_i32 = arith.constant 0 : i32
    %c0_i32_0 = arith.constant 0 : i32
    %c0_i32_1 = arith.constant 0 : i32
    return %c0_i32, %arg0, %c0_i32_0 : i32, i32, i32
  }
}

</mosaic_0001>

<bundles_post_ra>
// kernel: upsample1d_forward.1
= control target key start
LH: loop header
LB: loop body
LE: loop exit
PB: predicated region body
PF: predicated region fallthrough
CT: control target
= control target key end

     0   :  { %s674_s12 = smov 0   ;;  %s676_s13 = smov 0   ;;  %s753_s0 = inlined_call_operand.vmem [shape: bf16[32,8], index: 0, kind: input, shape index: {}]   ;;  %s754_s1 = inlined_call_operand.vmem [shape: bf16[2,16,8], index: 1, kind: input, shape index: {}]   ;;  %s755_s2 = inlined_call_operand.vmem [shape: f32[1,8], index: 2, kind: input, shape index: {}]   ;;  %s756_s3 = inlined_call_operand.vmem [shape: bf16[2,32,8], index: 3, kind: output, shape index: {}]  }
   0x1   :  { %s678_s14 = smov 0  }
   0x2 LB: > { %s687_s15 = sadd.s32 4294967295, %s650_s14   ;;  %s689_s16 = sadd.s32 1, %s650_s14   ;;  %s650_s14 = sphi %s678_s14, %s762_s14   ;;  %s646_s13 = sphi %s676_s13, %s761_s13   ;;  %s642_s12 = sphi %s674_s12, %s760_s12  }
   0x3   : > { %s85_s17 = ssub.s32 %s650_s14, %s689_s16  ;;  %s88_s18 = sadd.s32 1, %s646_s13 }
   0x4   : > { %p86_p0 = scmp.eq.s32.totalorder %s85_s17, 0  ;;  %p98_p1 = scmp.ne.s32.totalorder %s646_s13, %s642_s12 }
   0x5   : > { %p99_p2 = scmp.eq.s32.totalorder %s687_s15, 1  ;;  %p541_p3 = scmp.ge.s32.totalorder %s650_s14, 1 }
   0x6   : > { %s697_s19 = scalar_select %p86_p0, %s646_s13, %s88_s18  }
   0x7   : > { %p699_p4 = por %p99_p2, %p98_p1  ;;  %p138_p5 = scmp.lt.s32.totalorder %s650_s14, 3 }
   0x9   : > { %p139_p6 = pnand %p541_p3, %p138_p5 }
   0xa   : > { %v181_v0 = vld [vmem:[%s754_s1] sm:$0xf] (!%p139_p6)  ;;  %vm195_vm0 = vcmask (!%p139_p6), 1043456   ;;  %v546_v1 = vld [vmem:[%s754_s1 + $0xc] sm:$0xf] (!%p139_p6)  ;;  %v652_v2 = vmov (!%p139_p6), 0.0   ;;  %v171_v10 = vlaneseq (!%p139_p6) }
   0xb   : > { %142 = sbr.rel (%p139_p6) target bundleno = 259 (0x103), region = 32  ;;  %577 = vmatprep.subr.bf16.mxu0 (!%p139_p6), %v652_v2  ;;  %583 = vmatprep.subr.bf16.mxu1 (!%p139_p6), %v652_v2  ;;  %v197_v3 = vsel (!%p139_p6), %vm195_vm0, %v181_v0, 0  ;;  %v241_v4 = vsel (!%p139_p6), %vm195_vm0, %v546_v1, 0  ;;  %s543_s25 = sshll.u32 (!%p139_p6), %s687_s15, 1  ;;  %vm653_vm1 = vmmov (!%p139_p6), 0   ;;  %vm191_vm2 = vcmask (!%p139_p6), 64512  }
   0xc   : > { %578 = vmatpush3.bf16.msra.mxu0 (!%p139_p6), %v197_v3  ;;  %584 = vmatpush3.bf16.msra.mxu1 (!%p139_p6), %v241_v4  ;;  %p162_p7 = scmp.lt.s32.totalorder (!%p139_p6), %s543_s25, 3  ;;  %v182_v5 = vld [vmem:[%s754_s1 + $0x4] sm:$0xf] (!%p139_p6)  ;;  %v545_v6 = vld [vmem:[%s754_s1 + $0x8] sm:$0xf] (!%p139_p6)  ;;  %v172_v11 = vshrl.u32 (!%p139_p6), %v171_v10, 7 }
   0xd   : > { %579 = vmatprep.mubr.msk.bf16.mxu0 (!%p139_p6), %vm653_vm1, %v652_v2  ;;  %585 = vmatprep.mubr.msk.bf16.mxu1 (!%p139_p6), %vm653_vm1, %v652_v2  ;;  %v296_v7 = vsel (!%p139_p6), %vm195_vm0, %v182_v5, 0  ;;  %v351_v9 = vsel (!%p139_p6), %vm195_vm0, %v545_v6, 0  ;;  %s158_s7 = sand.u32 (!%p139_p6), 1, %s642_s12   ;;  %v552_v32 = vld [vmem:[%s755_s2] ss:$0 sm:$0xff] (!%p139_p6)  ;;  %vm410_vm7 = vcmask (!%p139_p6), 60416  }
   0xe   : > { %589 = vmatprep.subr.bf16.mxu0 (!%p139_p6), %v652_v2  ;;  %595 = vmatprep.subr.bf16.mxu1 (!%p139_p6), %v652_v2  ;;  %v173_v12 = vadd.s32 (!%p139_p6), 8, %v172_v11  ;;  %v174_v15 = vand.u32 (!%p139_p6), 15, %v172_v11  ;;  %vm286_vm3 = vcmp.lt.s32.totalorder (!%p139_p6), %v172_v11, 1  ;;  %vm341_vm4 = vcmp.lt.s32.totalorder (!%p139_p6), %v172_v11, 7  ;;  %s542_s10 = sshll.u32 (!%p139_p6), %s158_s7, 4 }
   0xf   : > { %s160_s11 = scalar_lea.vmem (!%p139_p6), [#allocation2], %s542_s10 }
  0x10   : > { %v175_v20 = vand.u32 (!%p139_p6), 15, %v173_v12  ;;  %vm176_vm5 = vcmp.eq.s32.totalorder (!%p139_p6), %v174_v15, 0 }
  0x12   : > { %s764_s25 = smov (!%p162_p7, %s543_s25), 3  ;;  %vm728_vm6 = vcmp.eq.s32.totalorder %v175_v20, 15  ;;  %s568_s12 = sshll.u32 (%p699_p4), %s687_s15, 3 }
  0x13   : > { %s544_s30 = sshll.u32 %s764_s25, 2  ;;  %s435_s18 = scalar_lea.vmem (%p699_p4), %s756_s3, %s568_s12 }
  0x14   : > { %s165_s6 = scalar_lea.vmem %s753_s0, %s544_s30 }
  0x15   : > { %v627_v8 = vld [vmem:[%s165_s6] sm:$0xff]  }
  0x16   : > { %580 = vmatmul.mubr.msk.bf16.vlgmr.msra.gmra.mrb[0].mxu0 %vm191_vm2, %v627_v8  ;;  %586 = vmatmul.mubr.msk.bf16.vlgmr.msra.gmra.mrb[0].mxu1 %vm191_vm2, %v627_v8 }
  0x17   : > { %590 = vmatpush3.bf16.msra.mxu0 %v296_v7  ;;  %596 = vmatpush3.bf16.msra.mxu1 %v351_v9 }
  0x18   : > { %591 = vmatprep.mubr.msk.bf16.mxu0 %vm653_vm1, %v652_v2  ;;  %597 = vmatprep.mubr.msk.bf16.mxu1 %vm653_vm1, %v652_v2 }
  0x1e   : > { %592 = vmatmul.mubr.msk.bf16.vlgmr.msra.gmra.mrb[4].mxu0 %vm191_vm2, %v627_v8  ;;  %598 = vmatmul.mubr.msk.bf16.vlgmr.msra.gmra.mrb[4].mxu1 %vm191_vm2, %v627_v8 }
  0xe9   : > { %v233_v13 = vpop.f32.mrb[0].mxu0  ;;  %v277_v14 = vpop.f32.mrb[0].mxu1 }
  0xea   : > { %v581_v16 = vpop.f32.mrb[1].mxu0  ;;  %v587_v17 = vpop.f32.mrb[1].mxu1  ;;  %v284_v21 = vrot.slane %v233_v13, 7  ;;  %v339_v22 = vrot.slane %v277_v14, 1 }
  0xeb   : > { %v236_v18 = vpop.f32.mrb[2].mxu0  ;;  %v280_v19 = vpop.f32.mrb[2].mxu1 }
  0xec   : > { %v285_v23 = vrot.slane %v236_v18, 7  ;;  %v340_v24 = vrot.slane %v280_v19, 1  ;;  %v582_v25 = vpop.f32.mrb[3].mxu0  ;;  %v588_v26 = vpop.f32.mrb[3].mxu1 }
  0xee   : > { %v288_v27 = vsel %vm286_vm3, %v285_v23, %v284_v21  ;;  %v342_v28 = vsel %vm341_vm4, %v339_v22, %v340_v24  ;;  %v287_v29 = vsel %vm286_vm3, %v284_v21, %v285_v23  ;;  %v343_v30 = vsel %vm341_vm4, %v340_v24, %v339_v22 }
  0xef   : > { %v293_v33 = vsel %vm176_vm5, 0.0, %v288_v27  ;;  %v349_v41 = vsel %vm728_vm6, 0.0, %v343_v30 }
  0xf1   : > { %v332_v34 = vpop.f32.mrb[4].mxu0  ;;  %v387_v35 = vpop.f32.mrb[4].mxu1 }
  0xf2   : > { %v333_v36 = vadd.f32 %v332_v34, %v293_v33  ;;  %v388_v37 = vadd.f32 %v387_v35, %v342_v28  ;;  %v593_v38 = vpop.f32.mrb[5].mxu0  ;;  %v599_v39 = vpop.f32.mrb[5].mxu1 }
  0xf3   : > { %v335_v40 = vpop.f32.mrb[6].mxu0  ;;  %v390_v42 = vpop.f32.mrb[6].mxu1 }
  0xf4   : > { %v400_v43 = vadd.f32 %v552_v32, %v333_v36  ;;  %v413_v44 = vadd.f32 %v552_v32, %v388_v37  ;;  %v336_v45 = vadd.f32 %v335_v40, %v287_v29  ;;  %v391_v46 = vadd.f32 %v390_v42, %v349_v41  ;;  %v594_v47 = vpop.f32.mrb[7].mxu0  ;;  %v600_v48 = vpop.f32.mrb[7].mxu1  ;;  %432 = sbr.rel (!%p699_p4) target bundleno = 259 (0x103), region = 36 }
  0xf6   : > { %v564_v49 = vpack.c.bf16 %v400_v43, %v400_v43  ;;  %v566_v50 = vpack.c.bf16 %v413_v44, %v413_v44  ;;  %v401_v51 = vadd.f32 %v552_v32, %v336_v45  ;;  %v414_v52 = vadd.f32 %v552_v32, %v391_v46 }
  0xf8   : > { %411 = vst.msk [vmem:[%s160_s11] sm:$0xf] %vm410_vm7, %v564_v49  ;;  %557 = vst.msk [vmem:[%s160_s11 + $0x8] sm:$0xf] %vm410_vm7, %v566_v50  ;;  %v565_v53 = vpack.c.bf16 %v401_v51, %v401_v51  ;;  %v567_v54 = vpack.c.bf16 %v414_v52, %v414_v52 }
  0xfa   : > { %412 = vst.msk [vmem:[%s160_s11 + $0x4] sm:$0xf] %vm410_vm7, %v565_v53  ;;  %558 = vst.msk [vmem:[%s160_s11 + $0xc] sm:$0xf] %vm410_vm7, %v567_v54 }
 0x101   : > { %v451_v55 = vld [vmem:[%s160_s11] sm:$0xff]   ;;  %v455_v56 = vld [vmem:[%s160_s11 + $0x8] sm:$0xff]  }
 0x102   : > { %452 = vst [vmem:[%s435_s18] sm:$0xff] %v451_v55   ;;  %456 = vst [vmem:[%s435_s18 + $0x10] sm:$0xff] %v455_v56  }
 0x103 PF: > { %p10_p8 = scmp.ge.s32.totalorder %s689_s16, 4   ;;  %s760_s12 = smov %s646_s13 }
 0x104   : > { %s761_s13 = smov %s697_s19  ;;  %s762_s14 = smov %s689_s16 }
 0x105   :  { %12 = sbr.rel (!%p10_p8) target bundleno = 2 (0x2), region = 105 }

</bundles_post_ra>
